<compile_context>
chip_gen: v7x
topology: tpu7x:2x2x1
jax: 0.10.0
libtpu: 0.0.40
codegen_flags: <defaults>
</compile_context>

<pallas_src>
import jax
import jax.numpy as jnp
from jax.experimental import pallas as pl
from jax.experimental.pallas import tpu as pltpu


def _hw_params():
    """Best-effort (VMEM capacity, TensorCores-per-device) query with safe fallbacks."""
    vmem_cap = None
    num_cores = 1
    try:
        info = pltpu.get_tpu_info()
        vmem_cap = getattr(info, "vmem_capacity_bytes", None)
        for name in ("num_cores", "num_tensorcores", "tensorcores_per_chip",
                     "core_count", "num_tensor_cores"):
            v = getattr(info, name, None)
            if isinstance(v, int) and v > 0:
                num_cores = v
                break
    except Exception:
        pass
    kind = ""
    try:
        kind = jax.devices()[0].device_kind.lower()
    except Exception:
        pass
    if vmem_cap is None:
        vmem_cap = (128 << 20) if ("v5" in kind or "v6" in kind) else (64 << 20)
    if num_cores == 1 and ("v4" in kind or "v5p" in kind or "7" in kind):
        num_cores = 2  # megacore / dual-TensorCore chips
    return vmem_cap, num_cores


def _choose_tiles(N, C, HW, itemsize, vmem_cap, num_cores):
    """Pick (bn, thw, vmem_limit): batch rows and spatial lanes per grid step."""
    if vmem_cap >= (100 << 20):
        vmem_limit, usable = 64 << 20, 56 << 20   # v5e / v6e: 128 MiB physical VMEM
    else:
        vmem_limit, usable = 44 << 20, 30 << 20   # v7x: 64 MiB physical VMEM

    CAP = 4096                                            # lanes; bounds in-kernel unroll
    floor = max(128, pl.cdiv(2048 // itemsize, 128) * 128)  # ~2 KB contiguous DMA runs

    def per_row(t):                    # VMEM bytes per batch row per grid step
        lw = t if t < 128 else 128
        return C * (2 * t * itemsize + 2 * lw * 4)  # dbl-buffered x + f32 sum/max accs

    if HW <= 128 or (HW <= CAP and per_row(HW) <= usable):
        thw = HW                       # full spatial extent: no tail, single k step
    else:
        t_fit = ((usable // C) - 1024) // (2 * itemsize)
        t_fit = (max(t_fit, 128) // 128) * 128
        thw = min(CAP, (HW // 128) * 128, max(t_fit, floor))

    bn = max(1, int(usable // per_row(thw)))
    bn = min(bn, N)
    if num_cores >= 2 and N >= num_cores:
        # Keep >= num_cores batch tiles so the "parallel" axis feeds every core (v7x);
        # single-TensorCore chips (v5e/v6e) keep the full batch tile.
        bn = min(bn, pl.cdiv(N, num_cores))
    if 8 < bn < N:
        bn = (bn // 8) * 8             # sublane-align the (bn, C) output block
    return bn, thw, vmem_limit


def _make_kernel(*, HW, thw, k_tiles, bn, fuse_mlp):
    """Build the kernel body; all arguments are static Python ints / bools."""
    needs_mask = (HW % thw) != 0                   # only possible when k_tiles > 1
    tail = HW - (k_tiles - 1) * thw                # valid lanes on the last k tile
    LW = 128 if thw >= 128 else thw                # accumulator lane width
    inv_hw = 1.0 / float(HW)
    GROUP = 8                                      # lane chunks fused per statement

    def _accumulate(x_ref, sum_acc, max_acc, limit):
        # Streaming path: pure elementwise add/max on the VPU over static 128-lane
        # chunks; no iota/compare/select, no per-step cross-lane (XLU) reduce.
        nfull = limit // LW
        rem = limit - nfull * LW
        base = 0
        while base < nfull:
            g = min(GROUP, nfull - base)
            chunks = [
                x_ref[:, :, (base + j) * LW:(base + j + 1) * LW].astype(jnp.float32)
                for j in range(g)
            ]
            s = chunks[0]
            m = chunks[0]
            for ch in chunks[1:]:
                s = s + ch
                m = jnp.maximum(m, ch)
            sum_acc[...] = sum_acc[...] + s
            max_acc[...] = jnp.maximum(max_acc[...], m)
            base += g
        if rem:
            start = nfull * LW
            xs = x_ref[:, :, start:start + rem].astype(jnp.float32)
            sum_acc[:, :, :rem] = sum_acc[:, :, :rem] + xs
            max_acc[:, :, :rem] = jnp.maximum(max_acc[:, :, :rem], xs)

    def _step(x_ref, sum_acc, max_acc):
        k = pl.program_id(2)

        @pl.when(k == 0)
        def _():
            sum_acc[...] = jnp.zeros_like(sum_acc)
            max_acc[...] = jnp.full_like(max_acc, -jnp.inf)

        if needs_mask:
            # Tail handling is free in the steady state: all tiles but the last
            # accumulate the full thw lanes; only the last tile statically shortens
            # the chunk list to the `tail` valid lanes (never touches padded data).
            @pl.when(k < k_tiles - 1)
            def _():
                _accumulate(x_ref, sum_acc, max_acc, thw)

            @pl.when(k == k_tiles - 1)
            def _():
                _accumulate(x_ref, sum_acc, max_acc, tail)
        else:
            _accumulate(x_ref, sum_acc, max_acc, thw)

        return k

    def _pooled(sum_acc, max_acc):
        # Single cross-lane reduce per (n, c) tile, only at finalize.
        avg = jnp.sum(sum_acc[...], axis=-1) * inv_hw            # (bn, Cb) f32
        mx = jnp.max(max_acc[...], axis=-1)                      # (bn, Cb) f32
        return avg, mx

    if fuse_mlp:
        def kernel(x_ref, w1t_ref, w2t_ref, out_ref, sum_acc, max_acc):
            k = _step(x_ref, sum_acc, max_acc)

            @pl.when(k == k_tiles - 1)
            def _():
                avg, mx = _pooled(sum_acc, max_acc)
                pooled = jnp.concatenate([avg, mx], axis=0)      # (2*bn, C) fused MLP
                h = jnp.maximum(
                    jnp.dot(pooled, w1t_ref[...],
                            preferred_element_type=jnp.float32), 0.0)
                y = jnp.dot(h, w2t_ref[...], preferred_element_type=jnp.float32)
                out_ref[...] = jax.nn.sigmoid(y[:bn] + y[bn:]).astype(out_ref.dtype)
        return kernel

    def kernel(x_ref, avg_ref, max_ref, sum_acc, max_acc):
        k = _step(x_ref, sum_acc, max_acc)

        @pl.when(k == k_tiles - 1)
        def _():
            avg, mx = _pooled(sum_acc, max_acc)
            avg_ref[...] = avg
            max_ref[...] = mx
    return kernel


def channel_attention(x, w_fc1, w_fc2, *, force_channel_split=None):
    """x: (N, C, H, W) NCHW.  w_fc1: (C//16, C, 1, 1).  w_fc2: (C, C//16, 1, 1)."""
    N, C, H, W = x.shape
    Cr = w_fc1.shape[0]
    HW = H * W
    itemsize = jnp.dtype(x.dtype).itemsize

    vmem_cap, num_cores = _hw_params()
    bn, thw, vmem_limit = _choose_tiles(N, C, HW, itemsize, vmem_cap, num_cores)
    n_tiles = pl.cdiv(N, bn)
    k_tiles = pl.cdiv(HW, thw)

    # v7x batch-1 megacore: if the batch axis has a single tile, split the channel
    # axis across TensorCores for the pooling (which dominates the cost); the tiny
    # MLP epilogue then runs in XLA. Single-TensorCore chips never take this path.
    if force_channel_split is not None:
        c_tiles = int(force_channel_split)
    elif (num_cores >= 2 and n_tiles == 1 and C % (128 * num_cores) == 0
          and HW * itemsize >= 4096):
        c_tiles = num_cores
    else:
        c_tiles = 1
    if c_tiles < 1 or C % c_tiles != 0 or (c_tiles > 1 and (C // c_tiles) % 128 != 0):
        c_tiles = 1
    Cb = C // c_tiles
    fuse_mlp = (c_tiles == 1)

    LW = 128 if thw >= 128 else thw
    x3 = x.reshape(N, C, HW)                              # layout-only reshape
    w1t = w_fc1.reshape(Cr, C).T.astype(jnp.float32)      # (C, Cr), pre-cast to f32
    w2t = w_fc2.reshape(C, Cr).T.astype(jnp.float32)      # (Cr, C)

    kernel = _make_kernel(HW=HW, thw=thw, k_tiles=k_tiles, bn=bn, fuse_mlp=fuse_mlp)

    cost = pl.CostEstimate(
        flops=2 * N * C * HW + 8 * N * C * Cr,
        transcendentals=N * C,
        bytes_accessed=N * C * HW * itemsize + 2 * C * Cr * 4 + N * C * itemsize,
    )
    compiler_params = pltpu.CompilerParams(
        dimension_semantics=("parallel", "parallel", "arbitrary"),
        vmem_limit_bytes=vmem_limit,
    )
    scratch = [pltpu.VMEM((bn, Cb, LW), jnp.float32),     # lane-wide running sum
               pltpu.VMEM((bn, Cb, LW), jnp.float32)]     # lane-wide running max
    grid = (n_tiles, c_tiles, k_tiles)

    if fuse_mlp:
        out = pl.pallas_call(
            kernel,
            out_shape=jax.ShapeDtypeStruct((N, C), x.dtype),
            grid_spec=pltpu.PrefetchScalarGridSpec(
                num_scalar_prefetch=0,
                grid=grid,
                in_specs=[
                    pl.BlockSpec((bn, Cb, thw), lambda n, c, k: (n, c, k)),
                    # Constant-index weight blocks (tiny, already f32).
                    pl.BlockSpec((C, Cr), lambda n, c, k: (0, 0)),
                    pl.BlockSpec((Cr, C), lambda n, c, k: (0, 0)),
                ],
                out_specs=pl.BlockSpec((bn, C), lambda n, c, k: (n, 0)),
                scratch_shapes=scratch,
            ),
            compiler_params=compiler_params,
            cost_estimate=cost,
        )(x3, w1t, w2t)
        return out.reshape(N, C, 1, 1)

    avg, mx = pl.pallas_call(
        kernel,
        out_shape=(jax.ShapeDtypeStruct((N, C), jnp.float32),
                   jax.ShapeDtypeStruct((N, C), jnp.float32)),
        grid_spec=pltpu.PrefetchScalarGridSpec(
            num_scalar_prefetch=0,
            grid=grid,
            in_specs=[pl.BlockSpec((bn, Cb, thw), lambda n, c, k: (n, c, k))],
            out_specs=[pl.BlockSpec((bn, Cb), lambda n, c, k: (n, c)),
                       pl.BlockSpec((bn, Cb), lambda n, c, k: (n, c))],
            scratch_shapes=scratch,
        ),
        compiler_params=compiler_params,
        cost_estimate=cost,
    )(x3)

    # Tiny (2N x C) MLP + sigmoid epilogue in XLA when the pooling was channel-split.
    def mlp(v):
        return jnp.maximum(v @ w1t, 0.0) @ w2t

    out = jax.nn.sigmoid(mlp(avg) + mlp(mx)).astype(x.dtype)
    return out.reshape(N, C, 1, 1)


def _reference(x, w_fc1, w_fc2):
    # Pure-JAX reference mirroring the PyTorch forward, for correctness checks.
    N, C, H, W = x.shape
    Cr = w_fc1.shape[0]
    w1 = w_fc1.reshape(Cr, C).astype(jnp.float32)
    w2 = w_fc2.reshape(C, Cr).astype(jnp.float32)
    avg = jnp.mean(x.astype(jnp.float32), axis=(2, 3))           # (N, C)
    mx = jnp.max(x, axis=(2, 3)).astype(jnp.float32)             # (N, C)

    def mlp(v):
        return jnp.maximum(v @ w1.T, 0.0) @ w2.T

    out = jax.nn.sigmoid(mlp(avg) + mlp(mx)).astype(x.dtype)
    return out.reshape(N, C, 1, 1)


if __name__ == "__main__":
    key = jax.random.PRNGKey(0)
    ks = jax.random.split(key, 9)

    def make_case(kx, kw1, kw2, N, C, H, W, dtype=jnp.float32):
        Cr = C // 16
        x = jax.random.normal(kx, (N, C, H, W), dtype=dtype)
        w1 = (jax.random.normal(kw1, (Cr, C, 1, 1), jnp.float32) * 0.1).astype(dtype)
        w2 = (jax.random.normal(kw2, (C, Cr, 1, 1), jnp.float32) * 0.1).astype(dtype)
        return x, w1, w2

    # Case 1: fused single-kernel path (small feature map, batch-parallel grid).
    x, w1, w2 = make_case(ks[0], ks[1], ks[2], N=2, C=64, H=16, W=16)
    out = jax.block_until_ready(channel_attention(x, w1, w2))
    assert out.shape == (2, 64, 1, 1)
    assert jnp.allclose(out, _reference(x, w1, w2), atol=1e-5, rtol=1e-5)

    # Case 2: spatial axis tiled over several grid steps (exercises accumulator
    # init/finalize gating and the static tail-chunk path; HW % 128 != 0).
    x, w1, w2 = make_case(ks[3], ks[4], ks[5], N=2, C=64, H=72, W=72)
    out = jax.block_until_ready(channel_attention(x, w1, w2))
    assert jnp.allclose(out, _reference(x, w1, w2), atol=1e-5, rtol=1e-5)

    # Case 3: batch-1 channel-split pooling path (v7x megacore layout), forced so it
    # is exercised on any chip; tiny MLP epilogue runs in XLA.
    x, w1, w2 = make_case(ks[6], ks[7], ks[8], N=1, C=256, H=15, W=15)
    out = jax.block_until_ready(channel_attention(x, w1, w2, force_channel_split=2))
    assert out.shape == (1, 256, 1, 1)
    assert jnp.allclose(out, _reference(x, w1, w2), atol=1e-5, rtol=1e-5)

    print("KERNEL_OK")
</pallas_src>

<mosaic_0001>
module attributes {stable_mosaic.version = 11 : i64} {
  func.func @kernel(%arg0: i32, %arg1: i32, %arg2: i32, %arg3: memref<2x64x256xf32, #tpu.memory_space<vmem>>, %arg4: memref<64x4xf32, #tpu.memory_space<vmem>>, %arg5: memref<4x64xf32, #tpu.memory_space<vmem>>, %arg6: memref<2x64xf32, #tpu.memory_space<vmem>>, %arg7: memref<2x64x128xf32, #tpu.memory_space<vmem>>, %arg8: memref<2x64x128xf32, #tpu.memory_space<vmem>>) attributes {dimension_semantics = [#tpu.dimension_semantics<parallel>, #tpu.dimension_semantics<parallel>, #tpu.dimension_semantics<arbitrary>], iteration_bounds = array<i64: 1, 1, 1>, scalar_prefetch = 0 : i64, scratch_operands = 2 : i64, tpu.core_type = #tpu.core_type<tc>, window_params = [{transform_indices = @transform_0, window_bounds = array<i64: 2, 64, 256>}, {pipeline_mode = #tpu.pipeline_mode<synchronous>, transform_indices = @transform_1, window_bounds = array<i64: 64, 4>}, {pipeline_mode = #tpu.pipeline_mode<synchronous>, transform_indices = @transform_2, window_bounds = array<i64: 4, 64>}, {transform_indices = @transform_3, window_bounds = array<i64: 2, 64>}]} {
    %c0_i32 = arith.constant 0 : i32
    %0 = arith.cmpi eq, %arg2, %c0_i32 : i32
    %1 = arith.extui %0 : i1 to i32
    %c0_i32_0 = arith.constant 0 : i32
    %2 = arith.cmpi ne, %1, %c0_i32_0 : i32
    scf.if %2 {
      %cst = arith.constant 0.000000e+00 : f32
      %16 = vector.broadcast %cst : f32 to vector<2x64x128xf32>
      %c0_19 = arith.constant 0 : index
      %c0_20 = arith.constant 0 : index
      %c0_21 = arith.constant 0 : index
      %17 = vector.load %arg7[%c0_19, %c0_20, %c0_21] : memref<2x64x128xf32, #tpu.memory_space<vmem>>, vector<2x64x128xf32>
      tpu.vector_store %arg7[%c0_19, %c0_20, %c0_21], %16 {strides = array<i32>} : memref<2x64x128xf32, #tpu.memory_space<vmem>>, vector<2x64x128xf32>,
      %cst_22 = arith.constant 0xFF800000 : f32
      %18 = vector.broadcast %cst_22 : f32 to vector<2x64x128xf32>
      %c0_23 = arith.constant 0 : index
      %c0_24 = arith.constant 0 : index
      %c0_25 = arith.constant 0 : index
      %19 = vector.load %arg8[%c0_23, %c0_24, %c0_25] : memref<2x64x128xf32, #tpu.memory_space<vmem>>, vector<2x64x128xf32>
      tpu.vector_store %arg8[%c0_23, %c0_24, %c0_25], %18 {strides = array<i32>} : memref<2x64x128xf32, #tpu.memory_space<vmem>>, vector<2x64x128xf32>,
    } else {
    }
    %c0 = arith.constant 0 : index
    %c0_1 = arith.constant 0 : index
    %c0_2 = arith.constant 0 : index
    %3 = vector.load %arg3[%c0, %c0_1, %c0_2] : memref<2x64x256xf32, #tpu.memory_space<vmem>>, vector<2x64x128xf32>
    %c0_3 = arith.constant 0 : index
    %c0_4 = arith.constant 0 : index
    %c128 = arith.constant 128 : index
    %4 = vector.load %arg3[%c0_3, %c0_4, %c128] : memref<2x64x256xf32, #tpu.memory_space<vmem>>, vector<2x64x128xf32>
    %5 = arith.addf %3, %4 : vector<2x64x128xf32>
    %6 = arith.maximumf %3, %4 : vector<2x64x128xf32>
    %c0_5 = arith.constant 0 : index
    %c0_6 = arith.constant 0 : index
    %c0_7 = arith.constant 0 : index
    %7 = vector.load %arg7[%c0_5, %c0_6, %c0_7] : memref<2x64x128xf32, #tpu.memory_space<vmem>>, vector<2x64x128xf32>
    %8 = arith.addf %7, %5 : vector<2x64x128xf32>
    %c0_8 = arith.constant 0 : index
    %c0_9 = arith.constant 0 : index
    %c0_10 = arith.constant 0 : index
    %9 = vector.load %arg7[%c0_8, %c0_9, %c0_10] : memref<2x64x128xf32, #tpu.memory_space<vmem>>, vector<2x64x128xf32>
    tpu.vector_store %arg7[%c0_8, %c0_9, %c0_10], %8 {strides = array<i32>} : memref<2x64x128xf32, #tpu.memory_space<vmem>>, vector<2x64x128xf32>,
    %c0_11 = arith.constant 0 : index
    %c0_12 = arith.constant 0 : index
    %c0_13 = arith.constant 0 : index
    %10 = vector.load %arg8[%c0_11, %c0_12, %c0_13] : memref<2x64x128xf32, #tpu.memory_space<vmem>>, vector<2x64x128xf32>
    %11 = arith.maximumf %10, %6 : vector<2x64x128xf32>
    %c0_14 = arith.constant 0 : index
    %c0_15 = arith.constant 0 : index
    %c0_16 = arith.constant 0 : index
    %12 = vector.load %arg8[%c0_14, %c0_15, %c0_16] : memref<2x64x128xf32, #tpu.memory_space<vmem>>, vector<2x64x128xf32>
    tpu.vector_store %arg8[%c0_14, %c0_15, %c0_16], %11 {strides = array<i32>} : memref<2x64x128xf32, #tpu.memory_space<vmem>>, vector<2x64x128xf32>,
    %c0_i32_17 = arith.constant 0 : i32
    %13 = arith.cmpi eq, %arg2, %c0_i32_17 : i32
    %14 = arith.extui %13 : i1 to i32
    %c0_i32_18 = arith.constant 0 : i32
    %15 = arith.cmpi ne, %14, %c0_i32_18 : i32
    scf.if %15 {
      %c0_19 = arith.constant 0 : index
      %c0_20 = arith.constant 0 : index
      %c0_21 = arith.constant 0 : index
      %16 = vector.load %arg7[%c0_19, %c0_20, %c0_21] : memref<2x64x128xf32, #tpu.memory_space<vmem>>, vector<2x64x128xf32>
      %cst = arith.constant dense<0.000000e+00> : vector<2x64xf32>
      %17 = vector.multi_reduction <add>, %16, %cst [2] : vector<2x64x128xf32> to vector<2x64xf32>
      %cst_22 = arith.constant 3.906250e-03 : f32
      %18 = vector.broadcast %cst_22 : f32 to vector<2x64xf32>
      %19 = arith.mulf %17, %18 : vector<2x64xf32>
      %c0_23 = arith.constant 0 : index
      %c0_24 = arith.constant 0 : index
      %c0_25 = arith.constant 0 : index
      %20 = vector.load %arg8[%c0_23, %c0_24, %c0_25] : memref<2x64x128xf32, #tpu.memory_space<vmem>>, vector<2x64x128xf32>
      %cst_26 = arith.constant dense<0xFF800000> : vector<2x64xf32>
      %21 = vector.multi_reduction <maximumf>, %20, %cst_26 [2] : vector<2x64x128xf32> to vector<2x64xf32>
      %22 = tpu.concatenate %19, %21 in 0 : vector<2x64xf32>, vector<2x64xf32> -> vector<4x64xf32>
      %c0_27 = arith.constant 0 : index
      %c0_28 = arith.constant 0 : index
      %23 = vector.load %arg4[%c0_27, %c0_28] : memref<64x4xf32, #tpu.memory_space<vmem>>, vector<64x4xf32>
      %cst_29 = arith.constant dense<0.000000e+00> : vector<4x4xf32>
      %24 = tpu.matmul %22, %23, %cst_29 {dimension_numbers = #tpu.dot_dimension_numbers<[1], [0], [0], [1], [0, 0, 1, 1], [], []>} : vector<4x64xf32>, vector<64x4xf32>, vector<4x4xf32> -> vector<4x4xf32>
      %cst_30 = arith.constant 0.000000e+00 : f32
      %25 = vector.broadcast %cst_30 : f32 to vector<4x4xf32>
      %26 = arith.maximumf %24, %25 : vector<4x4xf32>
      %c0_31 = arith.constant 0 : index
      %c0_32 = arith.constant 0 : index
      %27 = vector.load %arg5[%c0_31, %c0_32] : memref<4x64xf32, #tpu.memory_space<vmem>>, vector<4x64xf32>
      %cst_33 = arith.constant dense<0.000000e+00> : vector<4x64xf32>
      %28 = tpu.matmul %26, %27, %cst_33 {dimension_numbers = #tpu.dot_dimension_numbers<[1], [0], [0], [1], [0, 0, 1, 1], [], []>} : vector<4x4xf32>, vector<4x64xf32>, vector<4x64xf32> -> vector<4x64xf32>
      %29 = vector.extract_strided_slice %28 {offsets = [0, 0], sizes = [2, 64], strides = [1, 1]} : vector<4x64xf32> to vector<2x64xf32>
      %30 = vector.extract_strided_slice %28 {offsets = [2, 0], sizes = [2, 64], strides = [1, 1]} : vector<4x64xf32> to vector<2x64xf32>
      %31 = arith.addf %29, %30 : vector<2x64xf32>
      %32 = arith.negf %31 : vector<2x64xf32>
      %33 = math.exp %32 : vector<2x64xf32>
      %cst_34 = arith.constant 1.000000e+00 : f32
      %34 = vector.broadcast %cst_34 : f32 to vector<2x64xf32>
      %35 = arith.addf %34, %33 : vector<2x64xf32>
      %36 = arith.divf %34, %35 : vector<2x64xf32>
      %c0_35 = arith.constant 0 : index
      %c0_36 = arith.constant 0 : index
      %37 = vector.load %arg6[%c0_35, %c0_36] : memref<2x64xf32, #tpu.memory_space<vmem>>, vector<2x64xf32>
      tpu.vector_store %arg6[%c0_35, %c0_36], %36 {strides = array<i32>} : memref<2x64xf32, #tpu.memory_space<vmem>>, vector<2x64xf32>,
    } else {
    }
    return
  }
  func.func @transform_0(%arg0: i32, %arg1: i32, %arg2: i32) -> (i32, i32, i32) {
    %c0_i32 = arith.constant 0 : i32
    return %arg0, %arg1, %arg2 : i32, i32, i32
  }
  func.func @transform_1(%arg0: i32, %arg1: i32, %arg2: i32) -> (i32, i32) {
    %c0_i32 = arith.constant 0 : i32
    %c0_i32_0 = arith.constant 0 : i32
    %c0_i32_1 = arith.constant 0 : i32
    return %c0_i32, %c0_i32_0 : i32, i32
  }
  func.func @transform_2(%arg0: i32, %arg1: i32, %arg2: i32) -> (i32, i32) {
    %c0_i32 = arith.constant 0 : i32
    %c0_i32_0 = arith.constant 0 : i32
    %c0_i32_1 = arith.constant 0 : i32
    return %c0_i32, %c0_i32_0 : i32, i32
  }
  func.func @transform_3(%arg0: i32, %arg1: i32, %arg2: i32) -> (i32, i32) {
    %c0_i32 = arith.constant 0 : i32
    %c0_i32_0 = arith.constant 0 : i32
    return %arg0, %c0_i32 : i32, i32
  }
}

</mosaic_0001>

<bundles_post_ra>
// kernel: tpu_custom_call.1
= control target key start
LH: loop header
LB: loop body
LE: loop exit
PB: predicated region body
PF: predicated region fallthrough
CT: control target
= control target key end

     0   :  { %8 = vsyncpa [#allocation5], 0  ;;  %s1037_s0 = inlined_call_operand.hbm [shape: f32[2,64,256], index: 0, kind: input, shape index: {}]   ;;  %s1038_s1 = inlined_call_operand.vmem [shape: f32[64,4], index: 1, kind: input, shape index: {}]   ;;  %s1039_s2 = inlined_call_operand.vmem [shape: f32[4,64], index: 2, kind: input, shape index: {}]   ;;  %s1040_s3 = inlined_call_operand.hbm [shape: f32[2,64], index: 3, kind: output, shape index: {}]  }
   0x1   :  { %9 = vsyncpa [#allocation6], 0  ;;  %s851_s12 = smov [#allocation4]   ;;  %s803_s16 = scalar_lea.hbm %s1037_s0, 4096 }
   0x2   :  { %s15_s13 = sshll.u32 %s851_s12, 4  ;;  %p804_p0 = scmp.ne.s32.totalorder %s1037_s0, %s803_s16  ;;  %s16_s13 = int_to_ptr.vmem [resolvable:$true] %s15_s13 }
   0x3   :  { %p807_p1 = scmp.lt.u32.totalorder %s803_s16, %s1037_s0 }
   0x5   :  { %p809_p2 = pnand %p807_p1, %p804_p0 }
   0x7   :  { %812 = shalt.err (!%p809_p2)
}
   0x8   :  { %s813_s21 = scalar_lea.vmem %s16_s13, 4096  ;;  %p818_p4 = scmp.lt.s32.totalorder %s16_s13, %s16_s13 }
   0x9   :  { %p814_p3 = scmp.ne.s32.totalorder %s16_s13, %s813_s21  ;;  %p819_p5 = scmp.lt.s32.totalorder %s813_s21, %s813_s21 }
   0xb   :  { %p820_p6 = por %p819_p5, %p818_p4 }
   0xd   :  { %p821_p7 = pnand %p820_p6, %p814_p3 }
   0xf   :  { %824 = shalt.err (!%p821_p7)
}
  0x10   :  { %s852_s22 = smov 256   ;;  %s853_s23 = smov 16  }
  0x11   :  { %21 = dma.hbm_to_vmem [thread:$0]  %s1037_s0, 4096, %s16_s13, [#allocation5], %s852_s22, %s852_s22, %s853_s23  }
  0x12   :  { %847 = dma.done.wait [#allocation5], 4096  }
  0x13   :  { %848 = vsyncadd [#allocation5], 4294963200  ;;  %v73_v0 = vld [vmem:[#allocation4 + $0x80] sm:$0xff]  ;;  %v89_v1 = vld [vmem:[#allocation4 + $0x88] sm:$0xff]  ;;  %vm855_vm0 = vmmov 0   ;;  %vm367_vm1 = vcmask 130112  }
  0x14   :  { %v65_v2 = vld [vmem:[#allocation4] sm:$0xff]  ;;  %v105_v3 = vadd.f32 %v89_v1, %v73_v0  ;;  %v81_v4 = vld [vmem:[#allocation4 + $0x8] sm:$0xff]  ;;  %v74_v5 = vld [vmem:[#allocation4 + $0x90] sm:$0xff]  ;;  %v121_v27 = vmax.f32 %v73_v0, %v89_v1  ;;  %vm374_vm2 = vcmask 195712   ;;  %vm381_vm3 = vcmask 261312   ;;  %s857_s15 = smov [#allocation7]  }
  0x15   :  { %v90_v6 = vld [vmem:[#allocation4 + $0x98] sm:$0xff]  ;;  %v97_v7 = vadd.f32 %v81_v4, %v65_v2  ;;  %v66_v8 = vld [vmem:[#allocation4 + $0x10] sm:$0xff]  ;;  %v75_v12 = vld [vmem:[#allocation4 + $0xa0] sm:$0xff]  ;;  %v113_v25 = vmax.f32 %v65_v2, %v81_v4  ;;  %vm388_vm4 = vcmask 326912   ;;  %vm395_vm5 = vcmask 392512   ;;  %s732_s16 = sshll.u32 %s857_s15, 4  ;;  %s733_s16 = int_to_ptr.vmem [resolvable:$true] %s732_s16 }
  0x16   :  { %v82_v9 = vld [vmem:[#allocation4 + $0x18] sm:$0xff]  ;;  %260 = vadd.xlane.f32.xlu1 %v105_v3  ;;  %v106_v10 = vadd.f32 %v90_v6, %v74_v5  ;;  %v91_v13 = vld [vmem:[#allocation4 + $0xa8] sm:$0xff]  ;;  %v67_v14 = vld [vmem:[#allocation4 + $0x20] sm:$0xff]  ;;  %v122_v26 = vmax.f32 %v74_v5, %v90_v6  ;;  %v854_v3 = vmov 0.0|0.0   ;;  %vm402_vm6 = vcmask 458112   ;;  %p830_p9 = scmp.lt.s32.totalorder %s733_s16, %s733_s16 }
  0x17   :  { %244 = vadd.xlane.f32.xlu0 %v97_v7  ;;  %v98_v11 = vadd.f32 %v82_v9, %v66_v8  ;;  %v83_v15 = vld [vmem:[#allocation4 + $0x28] sm:$0xff]  ;;  %v107_v16 = vadd.f32 %v91_v13, %v75_v12  ;;  %v76_v18 = vld [vmem:[#allocation4 + $0xb0] sm:$0xff]  ;;  %v92_v19 = vld [vmem:[#allocation4 + $0xb8] sm:$0xff]  ;;  %v114_v24 = vmax.f32 %v66_v8, %v82_v9  ;;  %v123_v34 = vmax.f32 %v75_v12, %v91_v13 }
  0x18   :  { %v99_v17 = vadd.f32 %v83_v15, %v67_v14  ;;  %v68_v20 = vld [vmem:[#allocation4 + $0x30] sm:$0xff]  ;;  %v84_v21 = vld [vmem:[#allocation4 + $0x38] sm:$0xff]  ;;  %v108_v22 = vadd.f32 %v92_v19, %v76_v18  ;;  %v77_v28 = vld [vmem:[#allocation4 + $0xc0] sm:$0xff]  ;;  %v115_v35 = vmax.f32 %v67_v14, %v83_v15  ;;  %v124_v42 = vmax.f32 %v76_v18, %v92_v19  ;;  %780 = vmatprep.subr.bf16.mxu0 %v854_v3 }
  0x19   :  { %v100_v23 = vadd.f32 %v84_v21, %v68_v20  ;;  %v93_v29 = vld [vmem:[#allocation4 + $0xc8] sm:$0xff]  ;;  %v69_v30 = vld [vmem:[#allocation4 + $0x40] sm:$0xff]  ;;  %v78_v36 = vld [vmem:[#allocation4 + $0xd0] sm:$0xff]  ;;  %v116_v43 = vmax.f32 %v68_v20, %v84_v21  ;;  %v856_v13 = vmov 0.0   ;;  %vm409_vm7 = vcmask 523712  }
  0x1a   :  { %262 = vadd.xlane.f32.xlu1 %v106_v10  ;;  %v85_v31 = vld [vmem:[#allocation4 + $0x48] sm:$0xff]  ;;  %v109_v32 = vadd.f32 %v93_v29, %v77_v28  ;;  %v94_v37 = vld [vmem:[#allocation4 + $0xd8] sm:$0xff]  ;;  %v70_v38 = vld [vmem:[#allocation4 + $0x50] sm:$0xff]  ;;  %v125_v50 = vmax.f32 %v77_v28, %v93_v29  ;;  %772 = vmatprep.mubr.msk.f32.mxu0 %vm855_vm0, %v856_v13  ;;  %vm450_vm8 = vcmask 1041409   ;;  %vm547_vm9 = vcmask 1043459  }
  0x1b   :  { %246 = vadd.xlane.f32.xlu0 %v98_v11  ;;  %v101_v33 = vadd.f32 %v85_v31, %v69_v30  ;;  %v86_v39 = vld [vmem:[#allocation4 + $0x58] sm:$0xff]  ;;  %v110_v40 = vadd.f32 %v94_v37, %v78_v36  ;;  %v79_v44 = vld [vmem:[#allocation4 + $0xe0] sm:$0xff]  ;;  %v95_v45 = vld [vmem:[#allocation4 + $0xe8] sm:$0xff]  ;;  %v117_v51 = vmax.f32 %v69_v30, %v85_v31  ;;  %v126_v58 = vmax.f32 %v78_v36, %v94_v37 }
  0x1c   :  { %v102_v41 = vadd.f32 %v86_v39, %v70_v38  ;;  %v71_v46 = vld [vmem:[#allocation4 + $0x60] sm:$0xff]  ;;  %v87_v47 = vld [vmem:[#allocation4 + $0x68] sm:$0xff]  ;;  %v111_v48 = vadd.f32 %v95_v45, %v79_v44  ;;  %v80_v52 = vld [vmem:[#allocation4 + $0xf0] sm:$0xff]  ;;  %v118_v59 = vmax.f32 %v70_v38, %v86_v39  ;;  %v127_v60 = vmax.f32 %v79_v44, %v95_v45  ;;  %775 = vmatprep.subr.mxu1 %v856_v13 }
  0x1d   :  { %v103_v49 = vadd.f32 %v87_v47, %v71_v46  ;;  %v96_v53 = vld [vmem:[#allocation4 + $0xf8] sm:$0xff]  ;;  %v72_v54 = vld [vmem:[#allocation4 + $0x70] sm:$0xff]  ;;  %v119_v61 = vmax.f32 %v71_v46, %v87_v47  ;;  %v552_v0 = vld [vmem:[%s1038_s1] sm:$0xff]  ;;  %777 = vmatprep.mubr.msk.f32.mxu1 %vm855_vm0, %v856_v13  ;;  %v356_v30 = vlaneseq  ;;  %vm550_vm10 = vcmask 1041408  }
  0x1e   :  { %264 = vadd.xlane.f32.xlu1 %v107_v16  ;;  %v88_v55 = vld [vmem:[#allocation4 + $0x78] sm:$0xff]  ;;  %v112_v56 = vadd.f32 %v96_v53, %v80_v52  ;;  %v128_v62 = vmax.f32 %v80_v52, %v96_v53  ;;  %v553_v1 = vld [vmem:[%s1038_s1 + $0x8] sm:$0xff]  ;;  %v554_v4 = vld [vmem:[%s1038_s1 + $0x10] sm:$0xff]  ;;  %vm560_vm11 = vcmask 523264   ;;  %vm640_vm12 = vcmask 1043456  }
  0x1f   :  { %248 = vadd.xlane.f32.xlu0 %v99_v17  ;;  %v104_v57 = vadd.f32 %v88_v55, %v72_v54  ;;  %v120_v63 = vmax.f32 %v72_v54, %v88_v55  ;;  %v781_v2 = vpack.c.bf16 %v553_v1, %v552_v0  ;;  %v555_v5 = vld [vmem:[%s1038_s1 + $0x18] sm:$0xff]  ;;  %v556_v7 = vld [vmem:[%s1038_s1 + $0x20] sm:$0xff]  ;;  %v557_v8 = vld [vmem:[%s1038_s1 + $0x28] sm:$0xff]  ;;  %vm636_vm13 = vcmask 31744  }
  0x20   :  { %v784_v6 = vpack.c.bf16 %v555_v5, %v554_v4  ;;  %v787_v9 = vpack.c.bf16 %v557_v8, %v556_v7  ;;  %v558_v10 = vld [vmem:[%s1038_s1 + $0x30] sm:$0xff]  ;;  %v559_v11 = vld [vmem:[%s1038_s1 + $0x38] sm:$0xff]  ;;  %vm724_vm14 = vcmask 517120  }
  0x21   :  { %782 = vmatpush3.bf16.msra.mxu0 %v781_v2  ;;  %v790_v12 = vpack.c.bf16 %v559_v11, %v558_v10 }
  0x22   :  { %266 = vadd.xlane.f32.xlu1 %v108_v22  ;;  %783 = vmatprep.subr.bf16.mxu0 %v854_v3 }
  0x23   :  { %250 = vadd.xlane.f32.xlu0 %v100_v23 }
  0x25   :  { %785 = vmatpush3.bf16.msra.mxu0 %v784_v6 }
  0x26   :  { %310 = vmax.xlane.f32.xlu1 %v114_v24  ;;  %786 = vmatprep.subr.bf16.mxu0 %v854_v3 }
  0x27   :  { %308 = vmax.xlane.f32.xlu0 %v113_v25 }
  0x29   :  { %788 = vmatpush3.bf16.msra.mxu0 %v787_v9 }
  0x2a   :  { %326 = vmax.xlane.f32.xlu1 %v122_v26  ;;  %789 = vmatprep.subr.bf16.mxu0 %v854_v3 }
  0x2b   :  { %324 = vmax.xlane.f32.xlu0 %v121_v27 }
  0x2d   :  { %791 = vmatpush3.bf16.msra.mxu0 %v790_v12 }
  0x2e   :  { %268 = vadd.xlane.f32.xlu1 %v109_v32 }
  0x2f   :  { %252 = vadd.xlane.f32.xlu0 %v101_v33  ;;  %v357_v33 = vand.u32 127, %v356_v30 }
  0x31   :  { %v362_v36 = vadd.s32 4294967288, %v357_v33  ;;  %v369_v37 = vadd.s32 4294967280, %v357_v33  ;;  %v376_v39 = vadd.s32 4294967272, %v357_v33  ;;  %v383_v47 = vadd.s32 4294967264, %v357_v33 }
  0x32   :  { %328 = vmax.xlane.f32.xlu1 %v123_v34  ;;  %v359_v34 = vshrl.u32 %v356_v30, 7  ;;  %v397_v52 = vadd.s32 4294967248, %v357_v33 }
  0x33   :  { %312 = vmax.xlane.f32.xlu0 %v115_v35 }
  0x34   :  { %v934_v44 = vsub.s32 %v369_v37, %v359_v34  ;;  %v950_v4 = vsub.s32 %v397_v52, %v359_v34 }
  0x36   :  { %270 = vadd.xlane.f32.xlu1 %v110_v40  ;;  %v930_v40 = vsub.s32 %v357_v33, %v359_v34 }
  0x37   :  { %254 = vadd.xlane.f32.xlu0 %v102_v41 }
  0x3a   :  { %330 = vmax.xlane.f32.xlu1 %v124_v42  ;;  %v932_v42 = vsub.s32 %v362_v36, %v359_v34 }
  0x3b   :  { %314 = vmax.xlane.f32.xlu0 %v116_v43 }
  0x3e   :  { %272 = vadd.xlane.f32.xlu1 %v111_v48  ;;  %v390_v48 = vadd.s32 4294967256, %v357_v33 }
  0x3f   :  { %256 = vadd.xlane.f32.xlu0 %v103_v49 }
  0x40   :  { %v946_v0 = vsub.s32 %v390_v48, %v359_v34 }
  0x42   :  { %332 = vmax.xlane.f32.xlu1 %v125_v50 }
  0x43   :  { %316 = vmax.xlane.f32.xlu0 %v117_v51  ;;  %v936_v51 = vsub.s32 %v376_v39, %v359_v34 }
  0x46   :  { %274 = vadd.xlane.f32.xlu1 %v112_v56 }
  0x47   :  { %258 = vadd.xlane.f32.xlu0 %v104_v57  ;;  %v404_v57 = vadd.s32 4294967240, %v357_v33 }
  0x49   :  { %v955_v8 = vsub.s32 %v404_v57, %v359_v34 }
  0x4a   :  { %334 = vmax.xlane.f32.xlu1 %v126_v58 }
  0x4b   :  { %318 = vmax.xlane.f32.xlu0 %v118_v59 }
  0x4e   :  { %336 = vmax.xlane.f32.xlu1 %v127_v60 }
  0x4f   :  { %320 = vmax.xlane.f32.xlu0 %v119_v61 }
  0x52   :  { %338 = vmax.xlane.f32.xlu1 %v128_v62  ;;  %v944_v62 = vsub.s32 %v383_v47, %v359_v34 }
  0x53   :  { %322 = vmax.xlane.f32.xlu0 %v120_v63 }
  0xa3   :  { %v261_v14 = vpop.xlane.xlu1 %260 }
  0xa4   :  { %v245_v15 = vpop.xlane.xlu0 %244  ;;  %v284_v49 = vmul.f32 0.00390625, %v261_v14 }
  0xa5   :  { %v276_v53 = vmul.f32 0.00390625, %v245_v15 }
  0xa6   :  { %v414_v1 = vrot.slane %v284_v49, %v930_v40 }
  0xa7   :  { %v263_v16 = vpop.xlane.xlu1 %262  ;;  %v361_v5 = vrot.slane %v276_v53, %v930_v40 }
  0xa8   :  { %v247_v17 = vpop.xlane.xlu0 %246  ;;  %v285_v43 = vmul.f32 0.00390625, %v263_v16 }
  0xa9   :  { %v277_v46 = vmul.f32 0.00390625, %v247_v17 }
  0xaa   :  { %v418_v58 = vrot.slane %v285_v43, %v932_v42 }
  0xab   :  { %v265_v18 = vpop.xlane.xlu1 %264  ;;  %v366_v61 = vrot.slane %v277_v46, %v932_v42 }
  0xac   :  { %v249_v19 = vpop.xlane.xlu0 %248  ;;  %v286_v50 = vmul.f32 0.00390625, %v265_v18  ;;  %v419_v10 = vsel %vm367_vm1, %v418_v58, %v414_v1 }
  0xad   :  { %v278_v54 = vmul.f32 0.00390625, %v249_v19  ;;  %v368_v15 = vsel %vm367_vm1, %v366_v61, %v361_v5 }
  0xae   :  { %v423_v2 = vrot.slane %v286_v50, %v934_v44 }
  0xaf   :  { %v267_v20 = vpop.xlane.xlu1 %266  ;;  %v373_v6 = vrot.slane %v278_v54, %v934_v44 }
  0xb0   :  { %v251_v21 = vpop.xlane.xlu0 %250  ;;  %v287_v55 = vmul.f32 0.00390625, %v267_v20  ;;  %v424_v19 = vsel %vm374_vm2, %v423_v2, %v419_v10 }
  0xb1   :  { %v279_v59 = vmul.f32 0.00390625, %v251_v21 }
  0xb2   :  { %v428_v7 = vrot.slane %v287_v55, %v936_v51 }
  0xb3   :  { %v914_v22 = vpop.xlane.xlu1 %310  ;;  %v380_v11 = vrot.slane %v279_v59, %v936_v51 }
  0xb4   :  { %v916_v23 = vpop.xlane.xlu0 %308  ;;  %v476_v12 = vrot.slane %v914_v22, %v932_v42 }
  0xb5   :  { %v472_v13 = vrot.slane %v916_v23, %v930_v40  ;;  %v375_v23 = vsel %vm374_vm2, %v373_v6, %v368_v15 }
  0xb7   :  { %v918_v24 = vpop.xlane.xlu1 %326 }
  0xb8   :  { %v920_v25 = vpop.xlane.xlu0 %324  ;;  %v515_v16 = vrot.slane %v918_v24, %v932_v42  ;;  %v382_v24 = vsel %vm381_vm3, %v380_v11, %v375_v23 }
  0xb9   :  { %v511_v17 = vrot.slane %v920_v25, %v930_v40  ;;  %v477_v25 = vsel %vm367_vm1, %v476_v12, %v472_v13 }
  0xbb   :  { %v269_v26 = vpop.xlane.xlu1 %268  ;;  %v516_v39 = vsel %vm367_vm1, %v515_v16, %v511_v17  ;;  %v635_v16 = vld [vmem:[%s1039_s2] sm:$0xf]  ;;  %s825_s2 = scalar_lea.vmem %s733_s16, 32 }
  0xbc   :  { %v253_v27 = vpop.xlane.xlu0 %252  ;;  %v288_v63 = vmul.f32 0.00390625, %v269_v26  ;;  %v429_v26 = vsel %vm381_vm3, %v428_v7, %v424_v19  ;;  %776 = vmatpush3.msk.msra.mxu1 %vm640_vm12, %v635_v16  ;;  %p826_p8 = scmp.ne.s32.totalorder %s733_s16, %s825_s2  ;;  %p831_p10 = scmp.lt.s32.totalorder %s825_s2, %s825_s2 }
  0xbd   :  { %v280_v3 = vmul.f32 0.00390625, %v253_v27 }
  0xbe   :  { %v433_v18 = vrot.slane %v288_v63, %v944_v62  ;;  %p832_p11 = por %p831_p10, %p830_p9 }
  0xbf   :  { %v922_v28 = vpop.xlane.xlu1 %328  ;;  %v387_v20 = vrot.slane %v280_v3, %v944_v62 }
  0xc0   :  { %v924_v29 = vpop.xlane.xlu0 %312  ;;  %v520_v34 = vrot.slane %v922_v28, %v934_v44  ;;  %p833_p12 = pnand %p832_p11, %p826_p8 }
  0xc2   :  { %v521_v48 = vsel %vm374_vm2, %v520_v34, %v516_v39 }
  0xc3   :  { %v271_v31 = vpop.xlane.xlu1 %270 }
  0xc4   :  { %v255_v32 = vpop.xlane.xlu0 %254  ;;  %v289_v21 = vmul.f32 0.00390625, %v271_v31  ;;  %v434_v31 = vsel %vm388_vm4, %v433_v18, %v429_v26 }
  0xc5   :  { %v281_v22 = vmul.f32 0.00390625, %v255_v32  ;;  %v481_v32 = vrot.slane %v924_v29, %v934_v44 }
  0xc6   :  { %v438_v42 = vrot.slane %v289_v21, %v946_v0 }
  0xc7   :  { %v926_v35 = vpop.xlane.xlu1 %330  ;;  %v394_v43 = vrot.slane %v281_v22, %v946_v0 }
  0xc8   :  { %v928_v38 = vpop.xlane.xlu0 %314  ;;  %v525_v28 = vrot.slane %v926_v35, %v936_v51  ;;  %v439_v55 = vsel %vm395_vm5, %v438_v42, %v434_v31 }
  0xca   :  { %v526_v57 = vsel %vm381_vm3, %v525_v28, %v521_v48 }
  0xcb   :  { %v273_v41 = vpop.xlane.xlu1 %272 }
  0xcc   :  { %v257_v45 = vpop.xlane.xlu0 %256  ;;  %v290_v27 = vmul.f32 0.00390625, %v273_v41  ;;  %v389_v41 = vsel %vm388_vm4, %v387_v20, %v382_v24 }
  0xcd   :  { %v282_v30 = vmul.f32 0.00390625, %v257_v45  ;;  %v486_v45 = vrot.slane %v928_v38, %v936_v51  ;;  %v482_v38 = vsel %vm374_vm2, %v481_v32, %v477_v25 }
  0xce   :  { %v443_v46 = vrot.slane %v290_v27, %v950_v4 }
  0xcf   :  { %v938_v56 = vpop.xlane.xlu1 %332  ;;  %v401_v47 = vrot.slane %v282_v30, %v950_v4  ;;  %v487_v59 = vsel %vm381_vm3, %v486_v45, %v482_v38 }
  0xd0   :  { %v941_v60 = vpop.xlane.xlu0 %316  ;;  %v530_v29 = vrot.slane %v938_v56, %v944_v62  ;;  %v396_v56 = vsel %vm395_vm5, %v394_v43, %v389_v41 }
  0xd1   :  { %v491_v49 = vrot.slane %v941_v60, %v944_v62  ;;  %v444_v60 = vsel %vm402_vm6, %v443_v46, %v439_v55  ;;  %v403_v61 = vsel %vm402_vm6, %v401_v47, %v396_v56 }
  0xd2   :  { %v531_v62 = vsel %vm388_vm4, %v530_v29, %v526_v57 }
  0xd3   :  { %v275_v9 = vpop.xlane.xlu1 %274 }
  0xd4   :  { %v259_v14 = vpop.xlane.xlu0 %258  ;;  %v291_v36 = vmul.f32 0.00390625, %v275_v9 }
  0xd5   :  { %v283_v40 = vmul.f32 0.00390625, %v259_v14 }
  0xd6   :  { %v448_v50 = vrot.slane %v291_v36, %v955_v8 }
  0xd7   :  { %v335_v33 = vpop.xlane.xlu1 %334  ;;  %v408_v51 = vrot.slane %v283_v40, %v955_v8 }
  0xd8   :  { %v319_v37 = vpop.xlane.xlu0 %318  ;;  %v535_v35 = vrot.slane %v335_v33, %v946_v0  ;;  %v449_v1 = vsel %vm409_vm7, %v448_v50, %v444_v60 }
  0xd9   :  { %v496_v53 = vrot.slane %v319_v37, %v946_v0  ;;  %v492_v0 = vsel %vm388_vm4, %v491_v49, %v487_v59 }
  0xda   :  { %v536_v2 = vsel %vm395_vm5, %v535_v35, %v531_v62 }
  0xdb   :  { %v337_v44 = vpop.xlane.xlu1 %336  ;;  %v497_v6 = vsel %vm395_vm5, %v496_v53, %v492_v0 }
  0xdc   :  { %v321_v52 = vpop.xlane.xlu0 %320  ;;  %v540_v54 = vrot.slane %v337_v44, %v950_v4 }
  0xdd   :  { %v501_v58 = vrot.slane %v321_v52, %v950_v4  ;;  %v410_v4 = vsel %vm409_vm7, %v408_v51, %v403_v61 }
  0xde   :  { %v541_v7 = vsel %vm402_vm6, %v540_v54, %v536_v2  ;;  %v451_v13 = vsel %vm450_vm8, %v449_v1, %v410_v4 }
  0xdf   :  { %v339_v63 = vpop.xlane.xlu1 %338  ;;  %v502_v10 = vsel %vm402_vm6, %v501_v58, %v497_v6 }
  0xe0   :  { %v545_v3 = vrot.slane %v339_v63, %v955_v8  ;;  %v323_v5 = vpop.xlane.xlu0 %322 }
  0xe1   :  { %v506_v9 = vrot.slane %v323_v5, %v955_v8 }
  0xe2   :  { %v546_v11 = vsel %vm409_vm7, %v545_v3, %v541_v7 }
  0xe3   :  { %v507_v12 = vsel %vm409_vm7, %v506_v9, %v502_v10 }
  0xe4   :  { %v548_v14 = vsel %vm547_vm9, %v546_v11, %v507_v12 }
  0xe5   :  { %v551_v15 = vsel %vm550_vm10, %v451_v13, %v548_v14 }
  0xe6   :  { %773 = vmatmul.mubr.msk.f32.vlgmr.msra.gmra.mrb[0].mxu0 %vm560_vm11, %v551_v15 }
 0x1b9   :  { %v630_v8 = vpop.f32.mrb[0].mxu0 }
 0x1ba   :  { %v634_v17 = vmax.f32 %v630_v8, 0.0  ;;  %v774_v18 = vpop.f32.mrb[1].mxu0 }
 0x1bc   :  { %778 = vmatmul.mubr.msk.f32.vlgmr.msra.gmra.mrb[0].mxu1 %vm636_vm13, %v634_v17 }
 0x28f   :  { %v710_v19 = vpop.f32.mrb[0].mxu1 }
 0x290   :  { %v715_v20 = vrot.slane %v710_v19, 2  ;;  %v779_v21 = vpop.f32.mrb[1].mxu1 }
 0x292   :  { %v717_v22 = vadd.f32 %v715_v20, %v710_v19 }
 0x294   :  { %v744_v23 = vmul.f32 -1.442695, %v717_v22 }
 0x296   :  { %799 = vpow2.f32 %v744_v23 }
 0x2a0   :  { %v800_v26 = vpop.eup %799 }
 0x2a1   :  { %v721_v27 = vadd.f32 1.0, %v800_v26 }
 0x2a3   :  { %801 = vrcp.f32 %v721_v27 }
 0x2ad   :  { %v802_v30 = vpop.eup %801 }
 0x2ae   :  { %725 = vst.msk [vmem:[#allocation7] sm:$0x3] %vm724_vm14, %v802_v30 }
 0x2af   :  { %836 = shalt.err (!%p833_p12)
}
 0x2b0   :  { %s837_s19 = scalar_lea.hbm %s1040_s3, 32 }
 0x2b1   :  { %p838_p13 = scmp.ne.s32.totalorder %s1040_s3, %s837_s19  ;;  %p841_p0 = scmp.lt.u32.totalorder %s837_s19, %s1040_s3 }
 0x2b3   :  { %p843_p1 = pnand %p841_p0, %p838_p13 }
 0x2b5   :  { %846 = shalt.err (!%p843_p1)
}
 0x2b6   :  { %735 = dma.vmem_to_hbm [thread:$0]  %s733_s16, 32, %s1040_s3, [#allocation6]  }
 0x2b7   :  { %849 = dma.done.wait [#allocation6], 32  }
 0x2b8   :  { %850 = vsyncadd [#allocation6], 4294967264 }
 0x2b9   :  { %739 = vsyncpa [#allocation5], 1 }
 0x2ba   :  { %740 = vsyncpa [#allocation6], 1 }

</bundles_post_ra>
